<compile_context>
chip_gen: v7x
topology: tpu7x:2x2x1
jax: 0.10.0
libtpu: 0.0.40
codegen_flags: <defaults>
</compile_context>

<pallas_src>
import functools

import jax
import jax.numpy as jnp
from jax.experimental import pallas as pl
from jax.experimental.pallas import tpu as pltpu

REVERB_IR_LENGTH = 128   # length of the trainable impulse response
_K = 128                 # MXU reduction dim / lane width == FIR block size


def _round_up(x, m):
    return ((x + m - 1) // m) * m


# ---------------------------------------------------------------------------
# Pallas kernel: block-Toeplitz convolution   y[j] = x[j] @ H0 + x[j-1] @ H1
# ---------------------------------------------------------------------------
def _reverb_conv_kernel(x_ref, prev_ref, h0_ref, h1_ref, y_ref):
    # x_ref    : (tile_m, 128)  current tile of 128-sample input blocks
    # prev_ref : (T, 128)       last input block *before* each time tile
    #                            (row 0 is zeros: the convolution is causal)
    # h0_ref   : (128, 128)     in-block shifted-FIR matrix (upper triangular)
    # h1_ref   : (128, 128)     previous-block shifted-FIR matrix (strictly lower)
    # y_ref    : (tile_m, 128)  output tile
    t = pl.program_id(1)
    x = x_ref[...]
    edge = prev_ref[pl.ds(t, 1), :]                        # (1, 128)
    x_prev = jnp.concatenate([edge, x[:-1, :]], axis=0)    # x shifted down 1 block
    y = jnp.dot(x, h0_ref[...],
                preferred_element_type=jnp.float32,
                precision=jax.lax.Precision.HIGHEST)
    y = y + jnp.dot(x_prev, h1_ref[...],
                    preferred_element_type=jnp.float32,
                    precision=jax.lax.Precision.HIGHEST)
    y_ref[...] = y.astype(y_ref.dtype)


# ---------------------------------------------------------------------------
# FIR generation + Toeplitz factors (tiny — plain JAX, fuses into one pass)
# ---------------------------------------------------------------------------
def generate_fir(fir, drywet, decay):
    """final_fir = sigmoid(drywet)*fir*exp(-(exp(decay)+2)*t) + (1-sigmoid)*delta."""
    L = fir.shape[-1]
    t = jnp.linspace(0.0, 1.0, L, dtype=jnp.float32)   # == torch.linspace(0, 1, L)
    env = jnp.exp(-(jnp.exp(decay[0]) + 2.0) * t)
    decay_fir = fir * env
    ir_identity = jnp.zeros((1, L), jnp.float32).at[0, 0].set(1.0)
    wet = jax.nn.sigmoid(drywet[0])
    return wet * decay_fir + (1.0 - wet) * ir_identity


def _block_toeplitz_factors(h):
    """H0[p,q] = h[q-p] for q >= p;  H1[p,q] = h[q-p+128] for q < p; 0 elsewhere."""
    k = jnp.arange(_K)
    diff = k[None, :] - k[:, None]                         # q - p
    H0 = jnp.where(diff >= 0, h[jnp.clip(diff, 0, _K - 1)], 0.0)
    H1 = jnp.where(diff < 0, h[jnp.clip(diff + _K, 0, _K - 1)], 0.0)
    return H0.astype(jnp.float32), H1.astype(jnp.float32)


# ---------------------------------------------------------------------------
# Pallas wrapper: causal linear convolution of (B, N) signal with (L<=128,) FIR
# ---------------------------------------------------------------------------
def reverb_convolve(input_signal, final_fir, *, max_block_rows=2048):
    B, N = input_signal.shape
    L = final_fir.shape[-1]
    assert L <= _K, "TODO(synk): L > 128 needs extra shifted-H matrices"
    h = jnp.pad(final_fir.astype(jnp.float32), (0, _K - L))
    H0, H1 = _block_toeplitz_factors(h)

    # Tiling: 128-sample blocks along time; sublane-multiple tiles of blocks.
    # tile_m = 2048 -> 1 MiB per streamed tile (HBM-roofline knee); total VMEM
    # footprint (2 streamed arrays x 2 buffers + H0/H1/prev) ~= 4.5 MiB.
    M = pl.cdiv(N, _K)
    cap = max(8, _round_up(max_block_rows, 8))
    tile_m = min(_round_up(M, 8), cap)
    # v7x has 2 TensorCores: avoid collapsing to a (1, 1) parallel grid when
    # B == 1 and there is enough work to split the time axis.
    if B == 1 and pl.cdiv(M, tile_m) < 2 and M > 8:
        tile_m = _round_up(pl.cdiv(M, 2), 8)
    T = pl.cdiv(M, tile_m)
    M_pad = T * tile_m
    N_pad = M_pad * _K

    x3d = jnp.pad(input_signal.astype(jnp.float32),
                  ((0, 0), (0, N_pad - N))).reshape(B, M_pad, _K)

    # prev[b, t] = last 128-sample block before time-tile t (zeros for t == 0,
    # because the convolution is causal over a zero-padded signal).
    zeros = jnp.zeros((B, 1, _K), jnp.float32)
    if T > 1:
        tails = x3d[:, tile_m - 1::tile_m, :][:, :T - 1, :]
        prev = jnp.concatenate([zeros, tails], axis=1)      # (B, T, 128)
    else:
        prev = zeros                                         # (B, 1, 128)

    y3d = pl.pallas_call(
        _reverb_conv_kernel,
        grid=(B, T),
        in_specs=[
            # Streamed input tile: (tile_m, 128), lane-dense, sublane-multiple.
            pl.BlockSpec((None, tile_m, _K), lambda b, t: (b, t, 0)),
            # Previous-block table: whole (T, 128) slab, resident per batch row.
            pl.BlockSpec((None, T, _K), lambda b, t: (b, 0, 0)),
            # Shifted-FIR matrices: constant block index -> fetched once.
            pl.BlockSpec((_K, _K), lambda b, t: (0, 0)),
            pl.BlockSpec((_K, _K), lambda b, t: (0, 0)),
        ],
        out_specs=pl.BlockSpec((None, tile_m, _K), lambda b, t: (b, t, 0)),
        out_shape=jax.ShapeDtypeStruct((B, M_pad, _K), jnp.float32),
        compiler_params=pltpu.CompilerParams(
            dimension_semantics=("parallel", "parallel")),
    )(x3d, prev, H0, H1)

    return y3d.reshape(B, N_pad)[:, :N]


# ---------------------------------------------------------------------------
# Forward pass
# ---------------------------------------------------------------------------
def trainable_reverb_forward(params, input_signal, *, max_block_rows=2048):
    """TrainableReverb.forward: (batch, samples) f32 -> (batch, samples) f32."""
    fir, drywet, decay = params["fir"], params["drywet"], params["decay"]
    final_fir = generate_fir(fir, drywet, decay)[0]          # (L,)
    out = reverb_convolve(input_signal, final_fir, max_block_rows=max_block_rows)
    return out.astype(jnp.float32)


# ---------------------------------------------------------------------------
# Reference: direct time-domain linear convolution
# ---------------------------------------------------------------------------
def _reference_forward(params, input_signal):
    fir, drywet, decay = params["fir"], params["drywet"], params["decay"]
    N = input_signal.shape[-1]
    final_fir = generate_fir(fir, drywet, decay)[0]
    conv = jax.vmap(
        lambda s: jnp.convolve(s, final_fir, mode="full", precision="highest")
    )(input_signal)
    return conv[:, :N].astype(jnp.float32)


# ---------------------------------------------------------------------------
if __name__ == "__main__":
    key = jax.random.PRNGKey(0)
    k_fir, k_x = jax.random.split(key)

    L = REVERB_IR_LENGTH
    B, N = 2, 2048

    params = {
        "fir": jax.random.uniform(k_fir, (1, L), jnp.float32) * 2.0 - 1.0,
        "drywet": jnp.array([-1.0], jnp.float32),
        "decay": jnp.array([3.0], jnp.float32),
    }
    input_signal = jax.random.normal(k_x, (B, N), jnp.float32)

    ref = _reference_forward(params, input_signal)

    # Default tiling (single time tile per batch row at this size).
    out = jax.jit(trainable_reverb_forward)(params, input_signal)
    out = jax.block_until_ready(out)
    assert out.shape == (B, N) and out.dtype == jnp.float32
    max_err = float(jnp.max(jnp.abs(out - ref)))
    assert jnp.allclose(out, ref, rtol=1e-3, atol=1e-3), max_err

    # Force small time tiles to also exercise the cross-tile (x[j-1] @ H1) path.
    fwd_small = jax.jit(functools.partial(trainable_reverb_forward, max_block_rows=8))
    out_small = jax.block_until_ready(fwd_small(params, input_signal))
    max_err_small = float(jnp.max(jnp.abs(out_small - ref)))
    assert jnp.allclose(out_small, ref, rtol=1e-3, atol=1e-3), max_err_small

    print("KERNEL_OK")
</pallas_src>

<mosaic_0001>
module attributes {stable_mosaic.version = 11 : i64} {
  func.func @_reverb_conv_kernel(%arg0: i32, %arg1: i32, %arg2: memref<1x16x128xf32, #tpu.memory_space<vmem>>, %arg3: memref<1x1x128xf32, #tpu.memory_space<vmem>>, %arg4: memref<128x128xf32, #tpu.memory_space<vmem>>, %arg5: memref<128x128xf32, #tpu.memory_space<vmem>>, %arg6: memref<1x16x128xf32, #tpu.memory_space<vmem>>) attributes {dimension_semantics = [#tpu.dimension_semantics<parallel>, #tpu.dimension_semantics<parallel>], iteration_bounds = array<i64: 2, 1>, scalar_prefetch = 0 : i64, scratch_operands = 0 : i64, tpu.core_type = #tpu.core_type<tc>, window_params = [{transform_indices = @transform_0, window_bounds = array<i64: 1, 16, 128>}, {transform_indices = @transform_1, window_bounds = array<i64: 1, 1, 128>}, {pipeline_mode = #tpu.pipeline_mode<synchronous>, transform_indices = @transform_2, window_bounds = array<i64: 128, 128>}, {pipeline_mode = #tpu.pipeline_mode<synchronous>, transform_indices = @transform_3, window_bounds = array<i64: 128, 128>}, {transform_indices = @transform_4, window_bounds = array<i64: 1, 16, 128>}]} {
    %c0 = arith.constant 0 : index
    %c0_0 = arith.constant 0 : index
    %c0_1 = arith.constant 0 : index
    %0 = vector.load %arg2[%c0, %c0_0, %c0_1] : memref<1x16x128xf32, #tpu.memory_space<vmem>>, vector<1x16x128xf32>
    %1 = vector.shape_cast %0 : vector<1x16x128xf32> to vector<16x128xf32>
    %c0_2 = arith.constant 0 : index
    %2 = arith.index_cast %arg1 : i32 to index
    %c0_3 = arith.constant 0 : index
    %3 = vector.load %arg3[%c0_2, %2, %c0_3] : memref<1x1x128xf32, #tpu.memory_space<vmem>>, vector<1x1x128xf32>
    %4 = vector.shape_cast %3 : vector<1x1x128xf32> to vector<1x128xf32>
    %5 = vector.extract_strided_slice %1 {offsets = [0, 0], sizes = [15, 128], strides = [1, 1]} : vector<16x128xf32> to vector<15x128xf32>
    %6 = tpu.concatenate %4, %5 in 0 : vector<1x128xf32>, vector<15x128xf32> -> vector<16x128xf32>
    %c0_4 = arith.constant 0 : index
    %c0_5 = arith.constant 0 : index
    %7 = vector.load %arg4[%c0_4, %c0_5] : memref<128x128xf32, #tpu.memory_space<vmem>>, vector<128x128xf32>
    %cst = arith.constant dense<0.000000e+00> : vector<16x128xf32>
    %8 = tpu.matmul %1, %7, %cst {dimension_numbers = #tpu.dot_dimension_numbers<[1], [0], [0], [1], [0, 0, 1, 1], [], []>, precision = #tpu.contract_precision<fp32>} : vector<16x128xf32>, vector<128x128xf32>, vector<16x128xf32> -> vector<16x128xf32>
    %c0_6 = arith.constant 0 : index
    %c0_7 = arith.constant 0 : index
    %9 = vector.load %arg5[%c0_6, %c0_7] : memref<128x128xf32, #tpu.memory_space<vmem>>, vector<128x128xf32>
    %cst_8 = arith.constant dense<0.000000e+00> : vector<16x128xf32>
    %10 = tpu.matmul %6, %9, %cst_8 {dimension_numbers = #tpu.dot_dimension_numbers<[1], [0], [0], [1], [0, 0, 1, 1], [], []>, precision = #tpu.contract_precision<fp32>} : vector<16x128xf32>, vector<128x128xf32>, vector<16x128xf32> -> vector<16x128xf32>
    %11 = arith.addf %8, %10 : vector<16x128xf32>
    %c0_9 = arith.constant 0 : index
    %c0_10 = arith.constant 0 : index
    %c0_11 = arith.constant 0 : index
    %12 = vector.load %arg6[%c0_9, %c0_10, %c0_11] : memref<1x16x128xf32, #tpu.memory_space<vmem>>, vector<1x16x128xf32>
    %13 = vector.shape_cast %12 : vector<1x16x128xf32> to vector<16x128xf32>
    %14 = vector.shape_cast %11 : vector<16x128xf32> to vector<1x16x128xf32>
    tpu.vector_store %arg6[%c0_9, %c0_10, %c0_11], %14 {strides = array<i32>} : memref<1x16x128xf32, #tpu.memory_space<vmem>>, vector<1x16x128xf32>,
    return
  }
  func.func @transform_0(%arg0: i32, %arg1: i32) -> (i32, i32, i32) {
    %c0_i32 = arith.constant 0 : i32
    %c0_i32_0 = arith.constant 0 : i32
    return %arg0, %arg1, %c0_i32 : i32, i32, i32
  }
  func.func @transform_1(%arg0: i32, %arg1: i32) -> (i32, i32, i32) {
    %c0_i32 = arith.constant 0 : i32
    %c0_i32_0 = arith.constant 0 : i32
    %c0_i32_1 = arith.constant 0 : i32
    return %arg0, %c0_i32, %c0_i32_0 : i32, i32, i32
  }
  func.func @transform_2(%arg0: i32, %arg1: i32) -> (i32, i32) {
    %c0_i32 = arith.constant 0 : i32
    %c0_i32_0 = arith.constant 0 : i32
    %c0_i32_1 = arith.constant 0 : i32
    return %c0_i32, %c0_i32_0 : i32, i32
  }
  func.func @transform_3(%arg0: i32, %arg1: i32) -> (i32, i32) {
    %c0_i32 = arith.constant 0 : i32
    %c0_i32_0 = arith.constant 0 : i32
    %c0_i32_1 = arith.constant 0 : i32
    return %c0_i32, %c0_i32_0 : i32, i32
  }
  func.func @transform_4(%arg0: i32, %arg1: i32) -> (i32, i32, i32) {
    %c0_i32 = arith.constant 0 : i32
    %c0_i32_0 = arith.constant 0 : i32
    return %arg0, %arg1, %c0_i32 : i32, i32, i32
  }
}

</mosaic_0001>

<bundles_post_ra>
// kernel: trainable_reverb_forward.1
= control target key start
LH: loop header
LB: loop body
LE: loop exit
PB: predicated region body
PF: predicated region fallthrough
CT: control target
= control target key end

     0   :  { %s2891_s15 = smov 0   ;;  %s2893_s16 = smov 0   ;;  %s3832_s0 = inlined_call_operand.vmem [shape: f32[2,16,128], index: 0, kind: input, shape index: {}]   ;;  %s3833_s1 = inlined_call_operand.vmem [shape: f32[2,1,128], index: 1, kind: input, shape index: {}]   ;;  %s3834_s2 = inlined_call_operand.vmem [shape: f32[128,128], index: 2, kind: input, shape index: {}]   ;;  %s3835_s3 = inlined_call_operand.vmem [shape: f32[128,128], index: 3, kind: input, shape index: {}]   ;;  %s3836_s4 = inlined_call_operand.vmem [shape: f32[2,16,128], index: 4, kind: output, shape index: {}]  }
   0x1   :  { %s2895_s17 = smov 0  }
   0x2 LB: > { %s26_s18 = sadd.s32 1, %s2860_s16  ;;  %p1767_p0 = scmp.ge.s32.totalorder %s2864_s17, 1  ;;  %s2864_s17 = sphi %s2895_s17, %s14_s17   ;;  %s2860_s16 = sphi %s2893_s16, %s4034_s16   ;;  %s2856_s15 = sphi %s2891_s15, %s4033_s15  }
   0x3   : > { %p28_p1 = scmp.ge.s32.totalorder %s26_s18, 2  ;;  %p191_p2 = scmp.lt.s32.totalorder %s2864_s17, 3 }
   0x5   : > { %s4036_s18 = smov (%p28_p1, %s26_s18), 0  ;;  %p192_p3 = pnand %p1767_p0, %p191_p2 }
   0x7   : > { %195 = sbr.rel (%p192_p3) target bundleno = 434 (0x1b2), region = 36 }
   0xe   : > { %v2914_v0 = vld [vmem:[%s3835_s3] sm:$0xff]  ;;  %v2919_v1 = vld [vmem:[%s3835_s3 + $0x8] sm:$0xff]  ;;  %p229_p4 = scmp.lt.s32.totalorder %s2856_s15, 1  ;;  %v2938_v7 = vld [vmem:[%s3835_s3 + $0x10] sm:$0xff]  ;;  %vm257_vm0 = vcmask 1040384  }
   0xf   : > { %v2924_v2 = vld [vmem:[%s3834_s2] sm:$0xff]  ;;  %v297_v3 = vand.u32 4294901760, %v2914_v0  ;;  %v300_v4 = vand.u32 4294901760, %v2919_v1  ;;  %v2932_v5 = vld [vmem:[%s3834_s2 + $0x8] sm:$0xff]  ;;  %v2943_v8 = vld [vmem:[%s3835_s3 + $0x18] sm:$0xff]  ;;  %v3864_v10 = vand.u32 4294901760, %v2938_v7 }
  0x10   : > { %v981_v6 = vand.u32 4294901760, %v2924_v2  ;;  %v984_v9 = vand.u32 4294901760, %v2932_v5  ;;  %v3855_v11 = vand.u32 4294901760, %v2943_v8  ;;  %v2951_v12 = vld [vmem:[%s3834_s2 + $0x10] sm:$0xff]  ;;  %v2956_v13 = vld [vmem:[%s3834_s2 + $0x18] sm:$0xff]  ;;  %v2961_v14 = vld [vmem:[%s3835_s3 + $0x20] sm:$0xff] }
  0x11   : > { %v2967_v15 = vpack.c.bf16 %v300_v4, %v297_v3  ;;  %v3854_v16 = vand.u32 4294901760, %v2951_v12  ;;  %v3853_v17 = vand.u32 4294901760, %v2956_v13  ;;  %v2974_v18 = vld [vmem:[%s3835_s3 + $0x28] sm:$0xff]  ;;  %v3850_v19 = vand.u32 4294901760, %v2961_v14  ;;  %v2980_v20 = vld [vmem:[%s3834_s2 + $0x20] sm:$0xff]  ;;  %v3004_v26 = vld [vmem:[%s3835_s3 + $0x30] sm:$0xff] }
  0x12   : > { %v2985_v21 = vld [vmem:[%s3834_s2 + $0x28] sm:$0xff]  ;;  %v2991_v22 = vpack.c.bf16 %v984_v9, %v981_v6  ;;  %v2997_v23 = vpack.c.bf16 %v3855_v11, %v3864_v10  ;;  %v3849_v24 = vand.u32 4294901760, %v2974_v18  ;;  %v3848_v25 = vand.u32 4294901760, %v2980_v20  ;;  %v3009_v27 = vld [vmem:[%s3835_s3 + $0x38] sm:$0xff]  ;;  %v3014_v28 = vld [vmem:[%s3834_s2 + $0x30] sm:$0xff]  ;;  %s4038_s15 = smov (!%p229_p4, %s2856_s15), 1 }
  0x13   : > { %3927 = vst [vmem:[#allocation2_spill] sm:$0xff] %v2967_v15  ;;  %2413 = vmatprep.subr.bf16.mxu1 %v2967_v15  ;;  %v3026_v29 = vpack.c.bf16 %v3853_v17, %v3854_v16  ;;  %v3847_v30 = vand.u32 4294901760, %v2985_v21  ;;  %v3846_v31 = vand.u32 4294901760, %v3004_v26  ;;  %v3841_v32 = vand.u32 4294901760, %v3009_v27  ;;  %v3034_v33 = vld [vmem:[%s3834_s2 + $0x38] sm:$0xff]  ;;  %v3039_v34 = vld [vmem:[%s3835_s3 + $0x40] sm:$0xff]  ;;  %s240_s9 = scalar_lea.vmem %s3833_s1, %s4038_s15 }
  0x14   : > { %3928 = vst [vmem:[#allocation3_spill] sm:$0xff] %v2991_v22  ;;  %3929 = vst [vmem:[#allocation4_spill] sm:$0xff] %v2997_v23  ;;  %v3044_v35 = vld [vmem:[%s3835_s3 + $0x48] sm:$0xff]  ;;  %2605 = vmatprep.subr.bf16.mxu0 %v2991_v22  ;;  %2415 = vmatpush3.bf16.msra.mxu1 %v2967_v15  ;;  %v3052_v36 = vpack.c.bf16 %v3849_v24, %v3850_v19  ;;  %v3840_v37 = vand.u32 4294901760, %v3014_v28  ;;  %v3839_v38 = vand.u32 4294901760, %v3034_v33  ;;  %v3838_v39 = vand.u32 4294901760, %v3039_v34 }
  0x15   : > { %3930 = vst [vmem:[#allocation5_spill] sm:$0xff] %v3026_v29  ;;  %v3060_v40 = vld [vmem:[%s3834_s2 + $0x40] sm:$0xff]  ;;  %v3065_v41 = vld [vmem:[%s3834_s2 + $0x48] sm:$0xff]  ;;  %v3070_v42 = vld [vmem:[%s3835_s3 + $0x50] sm:$0xff]  ;;  %2607 = vmatpush3.bf16.msra.mxu0 %v2991_v22  ;;  %2417 = vmatprep.subr.bf16.mxu1 %v2997_v23  ;;  %v3078_v43 = vpack.c.bf16 %v3847_v30, %v3848_v25  ;;  %v3084_v44 = vpack.c.bf16 %v3841_v32, %v3846_v31  ;;  %v3837_v45 = vand.u32 4294901760, %v3044_v35  ;;  %s1774_s23 = sshll.u32 %s4038_s15, 4 }
  0x16   : > { %3931 = vst [vmem:[#allocation6_spill] sm:$0xff] %v3052_v36  ;;  %v3843_v46 = vand.u32 4294901760, %v3060_v40  ;;  %v3091_v47 = vld [vmem:[%s3835_s3 + $0x58] sm:$0xff]  ;;  %v3096_v48 = vld [vmem:[%s3834_s2 + $0x50] sm:$0xff]  ;;  %2609 = vmatprep.subr.bf16.mxu0 %v3026_v29  ;;  %v3109_v50 = vpack.c.bf16 %v3839_v38, %v3840_v37  ;;  %v3842_v51 = vand.u32 4294901760, %v3065_v41  ;;  %v3845_v52 = vand.u32 4294901760, %v3070_v42  ;;  %s236_s6 = scalar_lea.vmem %s3832_s0, %s1774_s23  ;;  %s249_s27 = scalar_lea.vmem %s3836_s4, %s1774_s23 }
  0x17   : > { %3932 = vst [vmem:[#allocation7_spill] sm:$0xff] %v3078_v43  ;;  %3933 = vst [vmem:[#allocation8_spill] sm:$0xff] %v3084_v44  ;;  %v3101_v49 = vld [vmem:[%s3834_s2 + $0x58] sm:$0xff]  ;;  %v3844_v53 = vand.u32 4294901760, %v3091_v47  ;;  %v3117_v54 = vld [vmem:[%s3835_s3 + $0x60] sm:$0xff]  ;;  %v3142_v57 = vpack.c.bf16 %v3837_v45, %v3838_v39  ;;  %v3852_v58 = vand.u32 4294901760, %v3096_v48 }
  0x18   : > { %3934 = vst [vmem:[#allocation9_spill] sm:$0xff] %v3109_v50  ;;  %v3122_v55 = vld [vmem:[%s3835_s3 + $0x68] sm:$0xff]  ;;  %v3127_v56 = vld [vmem:[%s3834_s2 + $0x60] sm:$0xff]  ;;  %v3851_v59 = vand.u32 4294901760, %v3101_v49  ;;  %v3857_v60 = vand.u32 4294901760, %v3117_v54  ;;  %v3155_v62 = vld [vmem:[%s3835_s3 + $0x70] sm:$0xff]  ;;  %2419 = vmatpush3.bf16.msra.mxu1 %v2997_v23  ;;  %v3167_v45 = vpack.c.bf16 %v3842_v51, %v3843_v46 }
  0x19   : > { %3935 = vst [vmem:[#allocation10_spill] sm:$0xff] %v3142_v57  ;;  %v3150_v61 = vld [vmem:[%s3834_s2 + $0x68] sm:$0xff]  ;;  %v3160_v63 = vld [vmem:[%s3835_s3 + $0x78] sm:$0xff]  ;;  %v3173_v39 = vpack.c.bf16 %v3844_v53, %v3845_v52  ;;  %v3856_v38 = vand.u32 4294901760, %v3122_v55  ;;  %v3859_v37 = vand.u32 4294901760, %v3127_v56  ;;  %v3180_v32 = vld [vmem:[%s3834_s2 + $0x70] sm:$0xff]  ;;  %2611 = vmatpush3.bf16.msra.mxu0 %v3026_v29  ;;  %2421 = vmatprep.subr.bf16.mxu1 %v3052_v36 }
  0x1a   : > { %3936 = vst [vmem:[#allocation11_spill] sm:$0xff] %v3167_v45  ;;  %v3185_v51 = vld [vmem:[%s3834_s2 + $0x78] sm:$0xff]  ;;  %v251_v46 = vld [vmem:[%s236_s6] sm:$0xff]  ;;  %v3193_v53 = vpack.c.bf16 %v3851_v59, %v3852_v58  ;;  %v3858_v52 = vand.u32 4294901760, %v3150_v61  ;;  %v3861_v31 = vand.u32 4294901760, %v3155_v62  ;;  %v3860_v30 = vand.u32 4294901760, %v3160_v63  ;;  %2613 = vmatprep.subr.bf16.mxu0 %v3078_v43 }
  0x1b   : > { %3937 = vst [vmem:[#allocation12_spill] sm:$0xff] %v3173_v39  ;;  %v254_v25 = vld [vmem:[%s240_s9] sm:$0x1]  ;;  %v3203_v24 = vpack.c.bf16 %v3856_v38, %v3857_v60  ;;  %v3863_v19 = vand.u32 4294901760, %v3180_v32  ;;  %v3862_v59 = vand.u32 4294901760, %v3185_v51  ;;  %v252_v58 = vld [vmem:[%s236_s6 + $0x8] sm:$0xff]  ;;  %v3224_v60 = vsub.f32 %v2914_v0, %v297_v3 }
  0x1c   : > { %3938 = vst [vmem:[#allocation13_spill] sm:$0xff] %v3193_v53  ;;  %v258_v17 = vrot.slane %v251_v46, 7  ;;  %v3211_v16 = vpack.c.bf16 %v3858_v52, %v3859_v37  ;;  %v3217_v11 = vpack.c.bf16 %v3860_v30, %v3861_v31  ;;  %v3219_v38 = vand.u32 4294901760, %v252_v58  ;;  %2423 = vmatpush3.bf16.msra.mxu1 %v3052_v36 }
  0x1d   : > { %v3231_v52 = vpack.c.bf16 %v3862_v59, %v3863_v19  ;;  %v3237_v30 = vsub.f32 %v2919_v1, %v300_v4  ;;  %v3239_v31 = vand.u32 4294901760, %v251_v46  ;;  %2615 = vmatpush3.bf16.msra.mxu0 %v3078_v43  ;;  %2425 = vmatprep.subr.bf16.mxu1 %v3084_v44  ;;  %v3249_v59 = vsub.f32 %v2924_v2, %v981_v6 }
  0x1e   : > { %3939 = vst [vmem:[#allocation14_spill] sm:$0xff] %v3217_v11  ;;  %v263_v37 = vsel %vm257_vm0, %v254_v25, %v258_v17  ;;  %v3254_v1 = vsub.f32 %v2932_v5, %v984_v9  ;;  %2617 = vmatprep.subr.bf16.mxu0 %v3109_v50  ;;  %v259_v19 = vrot.slane %v252_v58, 7  ;;  %v3262_v10 = vsub.f32 %v252_v58, %v3219_v38 }
  0x1f   : > { %3940 = vst [vmem:[#allocation15_spill] sm:$0xff] %v3231_v52  ;;  %3941 = vst [vmem:[#allocation16_spill] sm:$0xff] %v3239_v31  ;;  %v3243_v0 = vand.u32 4294901760, %v263_v37  ;;  %v3871_v4 = vand.u32 4294901760, %v3237_v30  ;;  %v3259_v25 = vsub.f32 %v251_v46, %v3239_v31  ;;  %v3944_v2 = vand.u32 4294901760, %v3224_v60 }
  0x20   : > { %3943 = vst [vmem:[#allocation18_spill] sm:$0xff] %v3262_v10  ;;  %2427 = vmatpush3.bf16.msra.mxu1 %v3084_v44  ;;  %v260_v43 = vsel %vm257_vm0, %v258_v17, %v259_v19  ;;  %v3945_v9 = vand.u32 4294901760, %v3249_v59  ;;  %v3946_v36 = vand.u32 4294901760, %v3254_v1  ;;  %v3949_v23 = vand.u32 4294901760, %v2938_v7 }
  0x21   : > { %3942 = vst [vmem:[#allocation17_spill] sm:$0xff] %v3243_v0  ;;  %v3265_v3 = vsub.f32 %v263_v37, %v3243_v0  ;;  %v401_v6 = vsub.f32 %v3224_v60, %v3944_v2  ;;  %v408_v46 = vsub.f32 %v3237_v30, %v3871_v4  ;;  %v3878_v58 = vand.u32 4294901760, %v3259_v25  ;;  %2619 = vmatpush3.bf16.msra.mxu0 %v3109_v50 }
  0x22   : > { %2429 = vmatprep.subr.bf16.mxu1 %v3142_v57  ;;  %v1085_v44 = vsub.f32 %v3249_v59, %v3945_v9  ;;  %v1092_v4 = vsub.f32 %v3254_v1, %v3946_v36  ;;  %2621 = vmatprep.subr.bf16.mxu0 %v3167_v45  ;;  %v3292_v37 = vand.u32 4294901760, %v260_v43  ;;  %v3947_v2 = vand.u32 4294901760, %v3262_v10 }
  0x23   : > { %v402_v5 = vand.u32 4294901760, %v401_v6  ;;  %v409_v17 = vand.u32 4294901760, %v408_v46  ;;  %v1064_v19 = vsub.f32 %v3259_v25, %v3878_v58  ;;  %v3948_v9 = vand.u32 4294901760, %v3265_v3 }
  0x24   : > { %v3297_v6 = vsub.f32 %v3262_v10, %v3947_v2  ;;  %v1086_v29 = vand.u32 4294901760, %v1085_v44  ;;  %v1093_v36 = vand.u32 4294901760, %v1092_v4  ;;  %v3305_v46 = vsub.f32 %v2938_v7, %v3949_v23  ;;  %2431 = vmatpush3.bf16.msra.mxu1 %v3142_v57 }
  0x25   : > { %v380_v50 = vsub.f32 %v3265_v3, %v3948_v9  ;;  %v3308_v58 = vpack.c.bf16 %v409_v17, %v402_v5  ;;  %v1065_v22 = vand.u32 4294901760, %v1064_v19  ;;  %v3311_v15 = vsub.f32 %v260_v43, %v3292_v37  ;;  %2623 = vmatpush3.bf16.msra.mxu0 %v3167_v45  ;;  %2433 = vmatprep.subr.bf16.mxu1 %v3173_v39 }
  0x26   : > { %v3316_v4 = vpack.c.bf16 %v1093_v36, %v1086_v29  ;;  %v3884_v7 = vand.u32 4294901760, %v3305_v46  ;;  %v3950_v23 = vand.u32 4294901760, %v2943_v8  ;;  %2625 = vmatprep.subr.bf16.mxu0 %v3193_v53  ;;  %v3951_v17 = vand.u32 4294901760, %v2951_v12 }
  0x27   : > { %v381_v44 = vand.u32 4294901760, %v380_v50  ;;  %2234 = vmatprep.mubr.f32.mxu0 %v1065_v22  ;;  %v3883_v43 = vand.u32 4294901760, %v3311_v15  ;;  %v3952_v29 = vand.u32 4294901760, %v2956_v13  ;;  %v3953_v9 = vand.u32 4294901760, %v2961_v14 }
  0x28   : > { %v3322_v5 = vsub.f32 %v2943_v8, %v3950_v23  ;;  %v3329_v19 = vsub.f32 %v2951_v12, %v3951_v17  ;;  %v415_v22 = vsub.f32 %v3305_v46, %v3884_v7  ;;  %v3954_v12 = vand.u32 4294901760, %v2974_v18  ;;  %2435 = vmatpush3.bf16.msra.mxu1 %v3173_v39 }
  0x29   : > { %v3334_v50 = vsub.f32 %v2956_v13, %v3952_v29  ;;  %v3339_v8 = vsub.f32 %v2961_v14, %v3953_v9  ;;  %2024 = vmatprep.mubr.f32.mxu1 %v381_v44  ;;  %v3955_v13 = vand.u32 4294901760, %v2980_v20  ;;  %v390_v14 = vsub.f32 %v3311_v15, %v3883_v43  ;;  %2627 = vmatpush3.bf16.msra.mxu0 %v3193_v53 }
  0x2a   : > { %v3885_v36 = vand.u32 4294901760, %v3322_v5  ;;  %v3348_v23 = vsub.f32 %v2974_v18, %v3954_v12  ;;  %v3890_v44 = vand.u32 4294901760, %v3329_v19  ;;  %2437 = vmatprep.subr.bf16.mxu1 %v3203_v24  ;;  %v416_v18 = vand.u32 4294901760, %v415_v22  ;;  %2629 = vmatprep.subr.bf16.mxu0 %v3211_v16 }
  0x2b   : > { %v3353_v17 = vsub.f32 %v2980_v20, %v3955_v13  ;;  %v3891_v29 = vand.u32 4294901760, %v3334_v50  ;;  %v3896_v9 = vand.u32 4294901760, %v3339_v8  ;;  %v391_v43 = vand.u32 4294901760, %v390_v14 }
  0x2c   : > { %v422_v20 = vsub.f32 %v3322_v5, %v3885_v36  ;;  %v3897_v12 = vand.u32 4294901760, %v3348_v23  ;;  %v1099_v7 = vsub.f32 %v3329_v19, %v3890_v44  ;;  %v3957_v39 = vand.u32 4294901760, %v2985_v21  ;;  %2439 = vmatpush3.bf16.msra.mxu1 %v3203_v24 }
  0x2d   : > { %v1106_v2 = vsub.f32 %v3334_v50, %v3891_v29  ;;  %v429_v22 = vsub.f32 %v3339_v8, %v3896_v9  ;;  %v3956_v53 = vand.u32 4294901760, %v3353_v17  ;;  %2631 = vmatpush3.bf16.msra.mxu0 %v3211_v16  ;;  %2441 = vmatprep.subr.bf16.mxu1 %v3217_v11 }
  0x2e   : > { %v423_v36 = vand.u32 4294901760, %v422_v20  ;;  %v436_v13 = vsub.f32 %v3348_v23, %v3897_v12  ;;  %v3388_v44 = vsub.f32 %v2985_v21, %v3957_v39  ;;  %v1100_v29 = vand.u32 4294901760, %v1099_v7  ;;  %2633 = vmatprep.subr.bf16.mxu0 %v3231_v52 }
  0x2f   : > { %v1113_v14 = vsub.f32 %v3353_v17, %v3956_v53  ;;  %v1107_v45 = vand.u32 4294901760, %v1106_v2  ;;  %v430_v57 = vand.u32 4294901760, %v429_v22  ;;  %v3958_v20 = vand.u32 4294901760, %v3004_v26 }
  0x30   : > { %v2448_v53 = vpack.c.bf16 %v423_v36, %v416_v18  ;;  %v437_v12 = vand.u32 4294901760, %v436_v13  ;;  %v3901_v21 = vand.u32 4294901760, %v3388_v44  ;;  %v3959_v7 = vand.u32 4294901760, %v3009_v27  ;;  %2443 = vmatpush3.bf16.msra.mxu1 %v3217_v11 }
  0x31   : > { %v3394_v9 = vsub.f32 %v3004_v26, %v3958_v20  ;;  %v1114_v10 = vand.u32 4294901760, %v1113_v14  ;;  %v2640_v39 = vpack.c.bf16 %v1107_v45, %v1100_v29  ;;  %v3960_v26 = vand.u32 4294901760, %v3014_v28  ;;  %2635 = vmatpush3.bf16.msra.mxu0 %v3231_v52  ;;  %2445 = vmatprep.subr.bf16.mxu1 %v3308_v58 }
  0x32   : > { %v3404_v22 = vsub.f32 %v3009_v27, %v3959_v7  ;;  %v3411_v36 = vpack.c.bf16 %v437_v12, %v430_v57  ;;  %v1120_v18 = vsub.f32 %v3388_v44, %v3901_v21  ;;  %v3961_v45 = vand.u32 4294901760, %v3034_v33  ;;  %2637 = vmatprep.subr.bf16.mxu0 %v3316_v4 }
  0x33   : > { %v3900_v2 = vand.u32 4294901760, %v3394_v9  ;;  %v3409_v20 = vsub.f32 %v3014_v28, %v3960_v26  ;;  %v3962_v13 = vand.u32 4294901760, %v3039_v34  ;;  %v3963_v14 = vand.u32 4294901760, %v3044_v35  ;;  %2025 = vmatmul.mubr.f32.vlgmr.msra.gmra.mrb[0].mxu1 %v391_v43 }
  0x34   : > { %v3419_v29 = vsub.f32 %v3034_v33, %v3961_v45  ;;  %v3902_v57 = vand.u32 4294901760, %v3404_v22  ;;  %v3964_v45 = vand.u32 4294901760, %v3060_v40  ;;  %2447 = vmatpush3.bf16.msra.mxu1 %v3308_v58  ;;  %v3966_v43 = vand.u32 4294901760, %v3065_v41  ;;  %2059 = vmatprep.mubr.f32.mxu1 %v3243_v0 }
  0x35   : > { %v3424_v27 = vsub.f32 %v3039_v34, %v3962_v13  ;;  %v443_v28 = vsub.f32 %v3394_v9, %v3900_v2  ;;  %v3903_v12 = vand.u32 4294901760, %v3409_v20  ;;  %v3435_v33 = vsub.f32 %v3044_v35, %v3963_v14  ;;  %2449 = vmatprep.subr.bf16.mxu1 %v2448_v53 }
  0x36   : > { %v1121_v34 = vand.u32 4294901760, %v1120_v18  ;;  %v3907_v7 = vand.u32 4294901760, %v3419_v29  ;;  %v3444_v13 = vsub.f32 %v3060_v40, %v3964_v45  ;;  %v450_v35 = vsub.f32 %v3404_v22, %v3902_v57 }
  0x37   : > { %v3906_v26 = vand.u32 4294901760, %v3424_v27  ;;  %v444_v2 = vand.u32 4294901760, %v443_v28  ;;  %v1127_v18 = vsub.f32 %v3409_v20, %v3903_v12  ;;  %v3909_v14 = vand.u32 4294901760, %v3435_v33 }
  0x38   : > { %v2644_v21 = vpack.c.bf16 %v1121_v34, %v1114_v10  ;;  %v1134_v40 = vsub.f32 %v3419_v29, %v3907_v7  ;;  %v3908_v45 = vand.u32 4294901760, %v3444_v13  ;;  %v3965_v57 = vand.u32 4294901760, %v3297_v6  ;;  %2451 = vmatpush3.bf16.msra.mxu1 %v2448_v53 }
  0x39   : > { %v457_v28 = vsub.f32 %v3424_v27, %v3906_v26  ;;  %v451_v12 = vand.u32 4294901760, %v450_v35  ;;  %v1128_v52 = vand.u32 4294901760, %v1127_v18  ;;  %v464_v10 = vsub.f32 %v3435_v33, %v3909_v14  ;;  %2453 = vmatprep.subr.bf16.mxu1 %v3411_v36 }
  0x3a   : > { %2235 = vmatmul.mubr.f32.vlgmr.msra.gmra.mrb[0].mxu0 %v3965_v57  ;;  %v3470_v34 = vsub.f32 %v3065_v41, %v3966_v43  ;;  %v1135_v26 = vand.u32 4294901760, %v1134_v40  ;;  %v1141_v58 = vsub.f32 %v3444_v13, %v3908_v45  ;;  %v3967_v6 = vand.u32 4294901760, %v3070_v42 }
  0x3b   : > { %2639 = vmatpush3.bf16.msra.mxu0 %v3316_v4  ;;  %v458_v7 = vand.u32 4294901760, %v457_v28  ;;  %v2456_v35 = vpack.c.bf16 %v451_v12, %v444_v2  ;;  %v465_v18 = vand.u32 4294901760, %v464_v10  ;;  %v3968_v43 = vand.u32 4294901760, %v3091_v47  ;;  %2269 = vmatprep.mubr.f32.mxu0 %v3239_v31 }
  0x3c   : > { %v3479_v57 = vsub.f32 %v3070_v42, %v3967_v6  ;;  %2641 = vmatprep.subr.bf16.mxu0 %v2640_v39  ;;  %v3917_v41 = vand.u32 4294901760, %v3470_v34  ;;  %v2648_v40 = vpack.c.bf16 %v1135_v26, %v1128_v52  ;;  %v1142_v28 = vand.u32 4294901760, %v1141_v58  ;;  %2455 = vmatpush3.bf16.msra.mxu1 %v3411_v36 }
  0x3d   : > { %v3485_v4 = vsub.f32 %v3091_v47, %v3968_v43  ;;  %v3969_v14 = vand.u32 4294901760, %v3096_v48  ;;  %v2460_v2 = vpack.c.bf16 %v465_v18, %v458_v7  ;;  %v3970_v52 = vand.u32 4294901760, %v3101_v49  ;;  %2457 = vmatprep.subr.bf16.mxu1 %v2456_v35 }
  0x3e   : > { %v3915_v45 = vand.u32 4294901760, %v3479_v57  ;;  %v1148_v47 = vsub.f32 %v3470_v34, %v3917_v41  ;;  %v3971_v7 = vand.u32 4294901760, %v3117_v54  ;;  %v3972_v10 = vand.u32 4294901760, %v3122_v55 }
  0x3f   : > { %v3492_v42 = vsub.f32 %v3096_v48, %v3969_v14  ;;  %v3910_v12 = vand.u32 4294901760, %v3485_v4  ;;  %v3502_v26 = vsub.f32 %v3101_v49, %v3970_v52  ;;  %2643 = vmatpush3.bf16.msra.mxu0 %v2640_v39  ;;  %v3973_v18 = vand.u32 4294901760, %v3127_v56 }
  0x40   : > { %v471_v48 = vsub.f32 %v3479_v57, %v3915_v45  ;;  %v3512_v14 = vsub.f32 %v3117_v54, %v3971_v7  ;;  %v3517_v58 = vsub.f32 %v3122_v55, %v3972_v10  ;;  %2645 = vmatprep.subr.bf16.mxu0 %v2644_v21  ;;  %v1149_v49 = vand.u32 4294901760, %v1148_v47  ;;  %2459 = vmatpush3.bf16.msra.mxu1 %v2456_v35 }
  0x41   : > { %v3913_v53 = vand.u32 4294901760, %v3492_v42  ;;  %v478_v39 = vsub.f32 %v3485_v4, %v3910_v12  ;;  %v3911_v6 = vand.u32 4294901760, %v3502_v26  ;;  %v3526_v43 = vsub.f32 %v3127_v56, %v3973_v18  ;;  %2461 = vmatprep.subr.bf16.mxu1 %v2460_v2 }
  0x42   : > { %v472_v54 = vand.u32 4294901760, %v471_v48  ;;  %v3912_v55 = vand.u32 4294901760, %v3512_v14  ;;  %v3914_v47 = vand.u32 4294901760, %v3517_v58  ;;  %v2652_v7 = vpack.c.bf16 %v1149_v49, %v1142_v28 }
  0x43   : > { %v1155_v52 = vsub.f32 %v3492_v42, %v3913_v53  ;;  %v479_v10 = vand.u32 4294901760, %v478_v39  ;;  %v1162_v12 = vsub.f32 %v3502_v26, %v3911_v6  ;;  %v3916_v56 = vand.u32 4294901760, %v3526_v43  ;;  %2647 = vmatpush3.bf16.msra.mxu0 %v2644_v21 }
  0x44   : > { %v485_v48 = vsub.f32 %v3512_v14, %v3912_v55  ;;  %v492_v18 = vsub.f32 %v3517_v58, %v3914_v47  ;;  %v3974_v36 = vand.u32 4294901760, %v3150_v61  ;;  %2649 = vmatprep.subr.bf16.mxu0 %v2648_v40  ;;  %v3975_v6 = vand.u32 4294901760, %v3155_v62  ;;  %2463 = vmatpush3.bf16.msra.mxu1 %v2460_v2 }
  0x45   : > { %v1156_v49 = vand.u32 4294901760, %v1155_v52  ;;  %v1163_v39 = vand.u32 4294901760, %v1162_v12  ;;  %v1169_v21 = vsub.f32 %v3526_v43, %v3916_v56  ;;  %v3976_v47 = vand.u32 4294901760, %v3160_v63 }
  0x46   : > { %v3547_v28 = vsub.f32 %v3150_v61, %v3974_v36  ;;  %v3555_v55 = vsub.f32 %v3155_v62, %v3975_v6  ;;  %v2464_v61 = vpack.c.bf16 %v479_v10, %v472_v54  ;;  %v486_v52 = vand.u32 4294901760, %v485_v48 }
  0x47   : > { %v3561_v45 = vsub.f32 %v3160_v63, %v3976_v47  ;;  %v3977_v36 = vand.u32 4294901760, %v3180_v32  ;;  %2651 = vmatpush3.bf16.msra.mxu0 %v2648_v40  ;;  %v493_v62 = vand.u32 4294901760, %v492_v18  ;;  %v3978_v63 = vand.u32 4294901760, %v3185_v51 }
  0x48   : > { %v1175_v53 = vand.u32 4294901760, %v3547_v28  ;;  %v498_v12 = vand.u32 4294901760, %v3555_v55  ;;  %2653 = vmatprep.subr.bf16.mxu0 %v2652_v7  ;;  %v2656_v54 = vpack.c.bf16 %v1163_v39, %v1156_v49  ;;  %v1170_v47 = vand.u32 4294901760, %v1169_v21  ;;  %2465 = vmatprep.subr.bf16.mxu1 %v2464_v61 }
  0x49   : > { %v3567_v56 = vsub.f32 %v3180_v32, %v3977_v36  ;;  %v505_v41 = vand.u32 4294901760, %v3561_v45  ;;  %v3574_v35 = vsub.f32 %v3185_v51, %v3978_v63  ;;  %v2468_v31 = vpack.c.bf16 %v493_v62, %v486_v52  ;;  %2467 = vmatpush3.bf16.msra.mxu1 %v2464_v61 }
  0x4a   : > { %v1176_v6 = vsub.f32 %v3547_v28, %v1175_v53  ;;  %v499_v10 = vsub.f32 %v3555_v55, %v498_v12  ;;  %v3980_v52 = vand.u32 4294901760, %v3237_v30  ;;  %v3983_v61 = vand.u32 4294901760, %v3305_v46 }
  0x4b   : > { %v1182_v32 = vand.u32 4294901760, %v3567_v56  ;;  %v506_v40 = vsub.f32 %v3561_v45, %v505_v41  ;;  %v1189_v18 = vand.u32 4294901760, %v3574_v35  ;;  %2655 = vmatpush3.bf16.msra.mxu0 %v2652_v7  ;;  %2469 = vmatprep.subr.bf16.mxu1 %v2468_v31  ;;  %v3979_v7 = vand.u32 4294901760, %v3224_v60 }
  0x4c   : > { %v1177_v48 = vand.u32 4294901760, %v1176_v6  ;;  %v500_v51 = vand.u32 4294901760, %v499_v10  ;;  %2657 = vmatprep.subr.bf16.mxu0 %v2656_v54  ;;  %v2476_v6 = vpack.c.bf16 %v3237_v30, %v3224_v60  ;;  %v3981_v10 = vand.u32 4294901760, %v3249_v59 }
  0x4d   : > { %v1183_v36 = vsub.f32 %v3567_v56, %v1182_v32  ;;  %v507_v63 = vand.u32 4294901760, %v506_v40  ;;  %v1190_v49 = vsub.f32 %v3574_v35, %v1189_v18  ;;  %v3588_v62 = vpack.c.bf16 %v3980_v52, %v3979_v7  ;;  %2471 = vmatpush3.bf16.msra.mxu1 %v2468_v31 }
  0x4e   : > { %v2660_v39 = vpack.c.bf16 %v1177_v48, %v1170_v47  ;;  %v3982_v47 = vand.u32 4294901760, %v3254_v1  ;;  %v3986_v60 = vand.u32 4294901760, %v3334_v50  ;;  %v3992_v52 = vand.u32 4294901760, %v3394_v9 }
  0x4f   : > { %v1184_v21 = vand.u32 4294901760, %v1183_v36  ;;  %v1191_v0 = vand.u32 4294901760, %v1190_v49  ;;  %2659 = vmatpush3.bf16.msra.mxu0 %v2656_v54  ;;  %v2472_v2 = vpack.c.bf16 %v507_v63, %v500_v51  ;;  %v3984_v54 = vand.u32 4294901760, %v3322_v5 }
  0x50   : > { %2661 = vmatprep.subr.bf16.mxu0 %v2660_v39  ;;  %v3594_v48 = vpack.c.bf16 %v3982_v47, %v3981_v10  ;;  %v3987_v36 = vand.u32 4294901760, %v3339_v8  ;;  %v3988_v51 = vand.u32 4294901760, %v3348_v23  ;;  %v3989_v49 = vand.u32 4294901760, %v3353_v17 }
  0x51   : > { %v2664_v11 = vpack.c.bf16 %v1191_v0, %v1184_v21  ;;  %v3600_v40 = vpack.c.bf16 %v3984_v54, %v3983_v61  ;;  %v3985_v0 = vand.u32 4294901760, %v3329_v19  ;;  %v3990_v21 = vand.u32 4294901760, %v3388_v44  ;;  %2473 = vmatprep.subr.bf16.mxu1 %v2472_v2 }
  0x52   : > { %v3612_v63 = vpack.c.bf16 %v3988_v51, %v3987_v36  ;;  %v3993_v10 = vand.u32 4294901760, %v3404_v22  ;;  %v3995_v61 = vand.u32 4294901760, %v3409_v20  ;;  %v3996_v54 = vand.u32 4294901760, %v3419_v29  ;;  %2475 = vmatpush3.bf16.msra.mxu1 %v2472_v2 }
  0x53   : > { %v3606_v30 = vpack.c.bf16 %v3986_v60, %v3985_v0  ;;  %v3618_v7 = vpack.c.bf16 %v3990_v21, %v3989_v49  ;;  %v3998_v60 = vand.u32 4294901760, %v3424_v27  ;;  %v3999_v36 = vand.u32 4294901760, %v3435_v33  ;;  %2663 = vmatpush3.bf16.msra.mxu0 %v2660_v39  ;;  %2477 = vmatprep.subr.bf16.mxu1 %v2476_v6 }
  0x54   : > { %v3624_v47 = vpack.c.bf16 %v3993_v10, %v3992_v52  ;;  %v3630_v0 = vpack.c.bf16 %v3996_v54, %v3995_v61  ;;  %v4000_v49 = vand.u32 4294901760, %v3444_v13  ;;  %v4001_v21 = vand.u32 4294901760, %v3470_v34  ;;  %2665 = vmatprep.subr.bf16.mxu0 %v2664_v11 }
  0x55   : > { %3991 = vst [vmem:[#allocation19_spill] sm:$0xff] %v3618_v7  ;;  %v3636_v51 = vpack.c.bf16 %v3999_v36, %v3998_v60  ;;  %v4002_v52 = vand.u32 4294901760, %v3479_v57  ;;  %v4003_v10 = vand.u32 4294901760, %v3485_v4  ;;  %v4004_v61 = vand.u32 4294901760, %v3492_v42  ;;  %2060 = vmatmul.mubr.f32.vlgmr.msra.gmra.mrb[0].mxu1 %v3292_v37 }
  0x56   : > { %3994 = vst [vmem:[#allocation20_spill] sm:$0xff] %v3624_v47  ;;  %3997 = vst [vmem:[#allocation21_spill] sm:$0xff] %v3630_v0  ;;  %v3642_v7 = vpack.c.bf16 %v4001_v21, %v4000_v49  ;;  %v4005_v54 = vand.u32 4294901760, %v3502_v26  ;;  %v4006_v31 = vand.u32 4294901760, %v3512_v14  ;;  %v4007_v60 = vand.u32 4294901760, %v3517_v58  ;;  %2479 = vmatpush3.bf16.msra.mxu1 %v2476_v6  ;;  %2094 = vmatprep.mubr.f32.mxu1 %v3265_v3 }
  0x57   : > { %v3648_v47 = vpack.c.bf16 %v4003_v10, %v4002_v52  ;;  %v4008_v49 = vand.u32 4294901760, %v3526_v43  ;;  %v3666_v52 = vpack.c.bf16 %v505_v41, %v498_v12  ;;  %v3668_v10 = vpack.c.bf16 %v1189_v18, %v1182_v32  ;;  %2667 = vmatpush3.bf16.msra.mxu0 %v2664_v11  ;;  %v4018_v41 = vld [vmem:[#allocation8_spill] sm:$0xff] }
  0x58   : > { %v3654_v0 = vpack.c.bf16 %v4005_v54, %v4004_v61  ;;  %v3660_v36 = vpack.c.bf16 %v4007_v60, %v4006_v31  ;;  %v2668_v61 = vpack.c.bf16 %v3254_v1, %v3249_v59  ;;  %v2480_v54 = vpack.c.bf16 %v3322_v5, %v3305_v46 }
  0x59   : > { %v3664_v21 = vpack.c.bf16 %v1175_v53, %v4008_v49  ;;  %v2672_v39 = vpack.c.bf16 %v3334_v50, %v3329_v19  ;;  %v2484_v59 = vpack.c.bf16 %v3348_v23, %v3339_v8  ;;  %v2676_v11 = vpack.c.bf16 %v3388_v44, %v3353_v17  ;;  %v4024_v53 = vld [vmem:[#allocation14_spill] sm:$0xff] }
  0x5a   : > { %2669 = vmatprep.subr.bf16.mxu0 %v2668_v61  ;;  %2270 = vmatmul.mubr.f32.vlgmr.msra.gmra.mrb[0].mxu0 %v3219_v38  ;;  %v2488_v1 = vpack.c.bf16 %v3404_v22, %v3394_v9  ;;  %v2680_v46 = vpack.c.bf16 %v3419_v29, %v3409_v20  ;;  %v2492_v5 = vpack.c.bf16 %v3435_v33, %v3424_v27  ;;  %v4009_v22 = vld [vmem:[#allocation2_spill] sm:$0xff]  ;;  %v4010_v20 = vld [vmem:[#allocation3_spill] sm:$0xff]  ;;  %v4012_v27 = vld [vmem:[#allocation4_spill] sm:$0xff] }
  0x5b   : > { %2671 = vmatpush3.bf16.msra.mxu0 %v2668_v61  ;;  %2481 = vmatprep.subr.bf16.mxu1 %v2480_v54  ;;  %v2684_v19 = vpack.c.bf16 %v3470_v34, %v3444_v13  ;;  %v2496_v50 = vpack.c.bf16 %v3485_v4, %v3479_v57  ;;  %v2688_v8 = vpack.c.bf16 %v3502_v26, %v3492_v42  ;;  %v4011_v29 = vld [vmem:[#allocation18_spill] sm:$0xff]  ;;  %v4013_v33 = vld [vmem:[#allocation5_spill] sm:$0xff]  ;;  %v4014_v13 = vand.u32 4294901760, %v3265_v3  ;;  %v4017_v57 = vld [vmem:[#allocation7_spill] sm:$0xff] }
  0x5c   : > { %2673 = vmatprep.subr.bf16.mxu0 %v2672_v39  ;;  %2304 = vmatprep.mubr.f32.mxu0 %v3259_v25  ;;  %v2500_v23 = vpack.c.bf16 %v3517_v58, %v3512_v14  ;;  %v2692_v17 = vpack.c.bf16 %v3547_v28, %v3526_v43  ;;  %v2504_v44 = vpack.c.bf16 %v3561_v45, %v3555_v55  ;;  %v4015_v45 = vand.u32 4294901760, %v3259_v25  ;;  %v4016_v34 = vld [vmem:[#allocation6_spill] sm:$0xff]  ;;  %v4019_v4 = vld [vmem:[#allocation9_spill] sm:$0xff]  ;;  %v4021_v25 = vld [vmem:[#allocation11_spill] sm:$0xff] }
  0x5d   : > { %2483 = vmatpush3.bf16.msra.mxu1 %v2480_v54  ;;  %v2696_v9 = vpack.c.bf16 %v3574_v35, %v3567_v56  ;;  %v4020_v3 = vld [vmem:[#allocation10_spill] sm:$0xff]  ;;  %v4022_v42 = vld [vmem:[#allocation12_spill] sm:$0xff]  ;;  %v4023_v26 = vld [vmem:[#allocation13_spill] sm:$0xff]  ;;  %v4026_v58 = vand.u32 4294901760, %v3311_v15  ;;  %v4027_v43 = vand.u32 4294901760, %v4011_v29 }
  0x5e   : > { %2485 = vmatprep.subr.bf16.mxu1 %v2484_v59  ;;  %v4025_v14 = vld [vmem:[#allocation15_spill] sm:$0xff]  ;;  %v4028_v55 = vld [vmem:[#allocation17_spill] sm:$0xff]  ;;  %v4029_v56 = vld [vmem:[#allocation16_spill] sm:$0xff] }
  0x5f   : > { %2675 = vmatpush3.bf16.msra.mxu0 %v2672_v39  ;;  %v4031_v28 = vld [vmem:[#allocation20_spill] sm:$0xff]  ;;  %v4032_v12 = vld [vmem:[#allocation21_spill] sm:$0xff] }
  0x60   : > { %2677 = vmatprep.subr.bf16.mxu0 %v2676_v11 }
  0x61   : > { %2487 = vmatpush3.bf16.msra.mxu1 %v2484_v59 }
  0x62   : > { %2489 = vmatprep.subr.bf16.mxu1 %v2488_v1 }
  0x63   : > { %2679 = vmatpush3.bf16.msra.mxu0 %v2676_v11 }
  0x64   : > { %2681 = vmatprep.subr.bf16.mxu0 %v2680_v46 }
  0x65   : > { %2491 = vmatpush3.bf16.msra.mxu1 %v2488_v1 }
  0x66   : > { %2493 = vmatprep.subr.bf16.mxu1 %v2492_v5 }
  0x67   : > { %2683 = vmatpush3.bf16.msra.mxu0 %v2680_v46 }
  0x68   : > { %2685 = vmatprep.subr.bf16.mxu0 %v2684_v19 }
  0x69   : > { %2495 = vmatpush3.bf16.msra.mxu1 %v2492_v5 }
  0x6a   : > { %2497 = vmatprep.subr.bf16.mxu1 %v2496_v50 }
  0x6b   : > { %2687 = vmatpush3.bf16.msra.mxu0 %v2684_v19 }
  0x6c   : > { %2689 = vmatprep.subr.bf16.mxu0 %v2688_v8 }
  0x6d   : > { %2499 = vmatpush3.bf16.msra.mxu1 %v2496_v50 }
  0x6e   : > { %2501 = vmatprep.subr.bf16.mxu1 %v2500_v23 }
  0x6f   : > { %2691 = vmatpush3.bf16.msra.mxu0 %v2688_v8 }
  0x70   : > { %2693 = vmatprep.subr.bf16.mxu0 %v2692_v17 }
  0x71   : > { %2503 = vmatpush3.bf16.msra.mxu1 %v2500_v23 }
  0x72   : > { %2505 = vmatprep.subr.bf16.mxu1 %v2504_v44 }
  0x73   : > { %2695 = vmatpush3.bf16.msra.mxu0 %v2692_v17 }
  0x74   : > { %2697 = vmatprep.subr.bf16.mxu0 %v2696_v9 }
  0x75   : > { %2507 = vmatpush3.bf16.msra.mxu1 %v2504_v44 }
  0x76   : > { %2509 = vmatprep.subr.bf16.mxu1 %v4009_v22 }
  0x77   : > { %2699 = vmatpush3.bf16.msra.mxu0 %v2696_v9 }
  0x78   : > { %2701 = vmatprep.subr.bf16.mxu0 %v4010_v20  ;;  %2095 = vmatmul.mubr.f32.vlgmr.msra.gmra.mrb[0].mxu1 %v3311_v15  ;;  %v4030_v15 = vld [vmem:[#allocation19_spill] sm:$0xff] }
  0x79   : > { %2511 = vmatpush3.bf16.msra.mxu1 %v4009_v22  ;;  %2129 = vmatprep.mubr.f32.mxu1 %v4014_v13 }
  0x7a   : > { %2305 = vmatmul.mubr.f32.vlgmr.msra.gmra.mrb[0].mxu0 %v4011_v29  ;;  %2513 = vmatprep.subr.bf16.mxu1 %v4012_v27 }
  0x7b   : > { %2703 = vmatpush3.bf16.msra.mxu0 %v4010_v20  ;;  %2339 = vmatprep.mubr.f32.mxu0 %v4015_v45 }
  0x7c   : > { %2705 = vmatprep.subr.bf16.mxu0 %v4013_v33 }
  0x7d   : > { %2515 = vmatpush3.bf16.msra.mxu1 %v4012_v27 }
  0x7e   : > { %2517 = vmatprep.subr.bf16.mxu1 %v4016_v34 }
  0x7f   : > { %2707 = vmatpush3.bf16.msra.mxu0 %v4013_v33 }
  0x80   : > { %2709 = vmatprep.subr.bf16.mxu0 %v4017_v57 }
  0x81   : > { %2519 = vmatpush3.bf16.msra.mxu1 %v4016_v34 }
  0x82   : > { %2521 = vmatprep.subr.bf16.mxu1 %v4018_v41 }
  0x83   : > { %2711 = vmatpush3.bf16.msra.mxu0 %v4017_v57 }
  0x84   : > { %2713 = vmatprep.subr.bf16.mxu0 %v4019_v4 }
  0x85   : > { %2523 = vmatpush3.bf16.msra.mxu1 %v4018_v41 }
  0x86   : > { %2525 = vmatprep.subr.bf16.mxu1 %v4020_v3 }
  0x87   : > { %2715 = vmatpush3.bf16.msra.mxu0 %v4019_v4 }
  0x88   : > { %2717 = vmatprep.subr.bf16.mxu0 %v4021_v25 }
  0x89   : > { %2527 = vmatpush3.bf16.msra.mxu1 %v4020_v3 }
  0x8a   : > { %2529 = vmatprep.subr.bf16.mxu1 %v4022_v42 }
  0x8b   : > { %2719 = vmatpush3.bf16.msra.mxu0 %v4021_v25 }
  0x8c   : > { %2721 = vmatprep.subr.bf16.mxu0 %v4023_v26 }
  0x8d   : > { %2531 = vmatpush3.bf16.msra.mxu1 %v4022_v42 }
  0x8e   : > { %2533 = vmatprep.subr.bf16.mxu1 %v3203_v24 }
  0x8f   : > { %2723 = vmatpush3.bf16.msra.mxu0 %v4023_v26 }
  0x90   : > { %2725 = vmatprep.subr.bf16.mxu0 %v3211_v16 }
  0x91   : > { %2535 = vmatpush3.bf16.msra.mxu1 %v3203_v24 }
  0x92   : > { %2537 = vmatprep.subr.bf16.mxu1 %v4024_v53 }
  0x93   : > { %2727 = vmatpush3.bf16.msra.mxu0 %v3211_v16 }
  0x94   : > { %2729 = vmatprep.subr.bf16.mxu0 %v4025_v14 }
  0x95   : > { %2539 = vmatpush3.bf16.msra.mxu1 %v4024_v53 }
  0x96   : > { %2541 = vmatprep.subr.bf16.mxu1 %v3588_v62 }
  0x97   : > { %2731 = vmatpush3.bf16.msra.mxu0 %v4025_v14 }
  0x98   : > { %2733 = vmatprep.subr.bf16.mxu0 %v3594_v48  ;;  %2130 = vmatmul.mubr.f32.vlgmr.msra.gmra.mrb[0].mxu1 %v4026_v58 }
  0x99   : > { %2543 = vmatpush3.bf16.msra.mxu1 %v3588_v62  ;;  %2164 = vmatprep.mubr.f32.mxu1 %v4028_v55 }
  0x9a   : > { %2340 = vmatmul.mubr.f32.vlgmr.msra.gmra.mrb[0].mxu0 %v4027_v43  ;;  %2545 = vmatprep.subr.bf16.mxu1 %v3600_v40 }
  0x9b   : > { %2735 = vmatpush3.bf16.msra.mxu0 %v3594_v48  ;;  %2374 = vmatprep.mubr.f32.mxu0 %v4029_v56 }
  0x9c   : > { %2737 = vmatprep.subr.bf16.mxu0 %v3606_v30 }
  0x9d   : > { %2547 = vmatpush3.bf16.msra.mxu1 %v3600_v40 }
  0x9e   : > { %2549 = vmatprep.subr.bf16.mxu1 %v3612_v63 }
  0x9f   : > { %2739 = vmatpush3.bf16.msra.mxu0 %v3606_v30 }
  0xa0   : > { %2741 = vmatprep.subr.bf16.mxu0 %v4030_v15 }
  0xa1   : > { %2551 = vmatpush3.bf16.msra.mxu1 %v3612_v63 }
  0xa2   : > { %2553 = vmatprep.subr.bf16.mxu1 %v4031_v28 }
  0xa3   : > { %2743 = vmatpush3.bf16.msra.mxu0 %v4030_v15 }
  0xa4   : > { %2745 = vmatprep.subr.bf16.mxu0 %v4032_v12 }
  0xa5   : > { %2555 = vmatpush3.bf16.msra.mxu1 %v4031_v28 }
  0xa6   : > { %2557 = vmatprep.subr.bf16.mxu1 %v3636_v51 }
  0xa7   : > { %2747 = vmatpush3.bf16.msra.mxu0 %v4032_v12 }
  0xa8   : > { %2749 = vmatprep.subr.bf16.mxu0 %v3642_v7 }
  0xa9   : > { %2559 = vmatpush3.bf16.msra.mxu1 %v3636_v51 }
  0xaa   : > { %2561 = vmatprep.subr.bf16.mxu1 %v3648_v47 }
  0xab   : > { %2751 = vmatpush3.bf16.msra.mxu0 %v3642_v7 }
  0xac   : > { %2753 = vmatprep.subr.bf16.mxu0 %v3654_v0 }
  0xad   : > { %2563 = vmatpush3.bf16.msra.mxu1 %v3648_v47 }
  0xae   : > { %2565 = vmatprep.subr.bf16.mxu1 %v3660_v36 }
  0xaf   : > { %2755 = vmatpush3.bf16.msra.mxu0 %v3654_v0 }
  0xb0   : > { %2757 = vmatprep.subr.bf16.mxu0 %v3664_v21 }
  0xb1   : > { %2567 = vmatpush3.bf16.msra.mxu1 %v3660_v36 }
  0xb2   : > { %2569 = vmatprep.subr.bf16.mxu1 %v3666_v52 }
  0xb3   : > { %2759 = vmatpush3.bf16.msra.mxu0 %v3664_v21 }
  0xb4   : > { %2761 = vmatprep.subr.bf16.mxu0 %v3668_v10 }
  0xb5   : > { %2571 = vmatpush3.bf16.msra.mxu1 %v3666_v52 }
  0xb6   : > { %2573 = vmatprep.subr.bf16.mxu1 %v4009_v22 }
  0xb7   : > { %2763 = vmatpush3.bf16.msra.mxu0 %v3668_v10 }
  0xb8   : > { %2765 = vmatprep.subr.bf16.mxu0 %v4010_v20  ;;  %2165 = vmatmul.mubr.f32.vlgmr.msra.gmra.mrb[0].mxu1 %v3292_v37 }
  0xb9   : > { %2575 = vmatpush3.bf16.msra.mxu1 %v4009_v22  ;;  %2199 = vmatprep.mubr.f32.mxu1 %v4028_v55 }
  0xba   : > { %2375 = vmatmul.mubr.f32.vlgmr.msra.gmra.mrb[0].mxu0 %v3219_v38  ;;  %2577 = vmatprep.subr.bf16.mxu1 %v4012_v27 }
  0xbb   : > { %2767 = vmatpush3.bf16.msra.mxu0 %v4010_v20  ;;  %2409 = vmatprep.mubr.f32.mxu0 %v4029_v56 }
  0xbc   : > { %2769 = vmatprep.subr.bf16.mxu0 %v4013_v33 }
  0xbd   : > { %2579 = vmatpush3.bf16.msra.mxu1 %v4012_v27 }
  0xbe   : > { %2581 = vmatprep.subr.bf16.mxu1 %v4016_v34 }
  0xbf   : > { %2771 = vmatpush3.bf16.msra.mxu0 %v4013_v33 }
  0xc0   : > { %2773 = vmatprep.subr.bf16.mxu0 %v4017_v57 }
  0xc1   : > { %2583 = vmatpush3.bf16.msra.mxu1 %v4016_v34 }
  0xc2   : > { %2585 = vmatprep.subr.bf16.mxu1 %v4018_v41 }
  0xc3   : > { %2775 = vmatpush3.bf16.msra.mxu0 %v4017_v57 }
  0xc4   : > { %2777 = vmatprep.subr.bf16.mxu0 %v4019_v4 }
  0xc5   : > { %2587 = vmatpush3.bf16.msra.mxu1 %v4018_v41 }
  0xc6   : > { %2589 = vmatprep.subr.bf16.mxu1 %v4020_v3 }
  0xc7   : > { %2779 = vmatpush3.bf16.msra.mxu0 %v4019_v4 }
  0xc8   : > { %2781 = vmatprep.subr.bf16.mxu0 %v4021_v25 }
  0xc9   : > { %2591 = vmatpush3.bf16.msra.mxu1 %v4020_v3 }
  0xca   : > { %2593 = vmatprep.subr.bf16.mxu1 %v4022_v42 }
  0xcb   : > { %2783 = vmatpush3.bf16.msra.mxu0 %v4021_v25 }
  0xcc   : > { %2785 = vmatprep.subr.bf16.mxu0 %v4023_v26 }
  0xcd   : > { %2595 = vmatpush3.bf16.msra.mxu1 %v4022_v42 }
  0xce   : > { %2597 = vmatprep.subr.bf16.mxu1 %v3203_v24 }
  0xcf   : > { %2787 = vmatpush3.bf16.msra.mxu0 %v4023_v26 }
  0xd0   : > { %2789 = vmatprep.subr.bf16.mxu0 %v3211_v16 }
  0xd1   : > { %2599 = vmatpush3.bf16.msra.mxu1 %v3203_v24 }
  0xd2   : > { %2601 = vmatprep.subr.bf16.mxu1 %v4024_v53 }
  0xd3   : > { %2791 = vmatpush3.bf16.msra.mxu0 %v3211_v16 }
  0xd4   : > { %2793 = vmatprep.subr.bf16.mxu0 %v4025_v14 }
  0xd5   : > { %2603 = vmatpush3.bf16.msra.mxu1 %v4024_v53 }
  0xd7   : > { %2795 = vmatpush3.bf16.msra.mxu0 %v4025_v14 }
  0xd8   : > { %2200 = vmatmul.mubr.f32.vlgmr.msra.gmra.mrb[0].mxu1 %v3292_v37 }
  0xda   : > { %2410 = vmatmul.mubr.f32.vlgmr.msra.gmra.mrb[0].mxu0 %v3219_v38 }
 0x1ab   : > { %v2201_v35 = vpop.f32.mrb[0].mxu1 }
 0x1ac   : > { %v970_v16 = vpop.f32.mrb[1].mxu1 }
 0x1ad   : > { %v2411_v24 = vpop.f32.mrb[0].mxu0 }
 0x1ae   : > { %v2796_v32 = vadd.f32 %v2411_v24, %v2201_v35  ;;  %v1654_v18 = vpop.f32.mrb[1].mxu0 }
 0x1af   : > { %v2797_v6 = vadd.f32 %v1654_v18, %v970_v16 }
 0x1b0   : > { %1665 = vst [vmem:[%s249_s27 + $0x8] sm:$0xff] %v2796_v32 }
 0x1b1   : > { %1664 = vst [vmem:[%s249_s27] sm:$0xff] %v2797_v6 }
 0x1b2 PF: > { %s14_s17 = sadd.s32 1, %s2864_s17   ;;  %s4033_s15 = smov %s2860_s16 }
 0x1b3   : > { %p11_p5 = scmp.ge.s32.totalorder %s14_s17, 4   ;;  %s4034_s16 = smov %s4036_s18 }
 0x1b5   :  { %13 = sbr.rel (!%p11_p5) target bundleno = 2 (0x2), region = 70 }

</bundles_post_ra>
